<compile_context>
chip_gen: v7x
topology: tpu7x:2x2x1
jax: 0.10.0
libtpu: 0.0.40
codegen_flags: <defaults>
</compile_context>

<pallas_src>
import jax
import jax.numpy as jnp
from jax import lax
from jax.experimental import pallas as pl
from jax.experimental.pallas import tpu as pltpu


def _round_up(x, m):
    return (x + m - 1) // m * m


def _vmem_limit(nbytes):
    # Generous headroom; floor at the default scoped limit, cap below v7x VMEM.
    return int(min(max(2 * nbytes + (2 << 20), 16 << 20), 64 << 20))


# ---------------------------------------------------------------------------
# Kernel 1: fully parallel, gate-fused input projection  gi = x @ W_ih + b_gi
# ---------------------------------------------------------------------------
def _gi_proj_kernel(x_ref, w_ref, b_ref, gi_ref):
    tt, bb, isz = x_ref.shape
    x = x_ref[...].reshape(tt * bb, isz)
    gi = jnp.dot(x.astype(w_ref.dtype), w_ref[...],
                 preferred_element_type=jnp.float32)
    gi_ref[...] = (gi.reshape(tt, bb, -1) + b_ref[...]).astype(gi_ref.dtype)


# ---------------------------------------------------------------------------
# Kernel 2: sequential masked-GRU recurrence over time blocks
# ---------------------------------------------------------------------------
def _maskgru_rec_kernel(gi_ref, m_ref, h0_ref, whh_ref, bhn_ref,
                        out_ref, hout_ref, h_scr):
    t_blk = pl.program_id(1)

    # Time axis resets for every batch block, so re-seed the state at t == 0.
    @pl.when(t_blk == 0)
    def _():
        h_scr[...] = h0_ref[...].astype(jnp.float32)

    tt = gi_ref.shape[0]
    hp = h_scr.shape[-1]

    whh = whh_ref[...]                          # (Hp, 3Hp), resident weights
    b_hn = bhn_ref[...].astype(jnp.float32)     # (1, Hp)

    def step(k, h):
        gi = gi_ref[k].astype(jnp.float32)                       # (B, 3Hp)
        gh = jnp.dot(h.astype(whh.dtype), whh,
                     preferred_element_type=jnp.float32)         # (B, 3Hp)
        r = jax.nn.sigmoid(gi[:, :hp] + gh[:, :hp])
        z = jax.nn.sigmoid(gi[:, hp:2 * hp] + gh[:, hp:2 * hp])
        n = jnp.tanh(gi[:, 2 * hp:] + r * (gh[:, 2 * hp:] + b_hn))
        h_t = n + z * (h - n)                    # == (1 - z) * n + z * h
        m = m_ref[k].astype(jnp.float32)         # (B, 1)
        out_ref[k] = (h_t * m).astype(out_ref.dtype)
        return h + m * (h_t - h)                 # == h_t*m + h*(1 - m)

    h = lax.fori_loop(0, tt, step, h_scr[...], unroll=True)
    h_scr[...] = h

    # Only materialize the final hidden state on the last time block.
    @pl.when(t_blk == pl.num_programs(1) - 1)
    def _():
        hout_ref[...] = h.astype(hout_ref.dtype)


# ---------------------------------------------------------------------------
# Wrapper
# ---------------------------------------------------------------------------
def mask_gru_pallas(seq_input, seq_mask, hidden, w_ih, w_hh, b_ih, b_hh,
                    *, block_t=16, block_b=None):
    """seq_input (T,B,I), seq_mask (T,B), hidden (1,B,H); PyTorch GRUCell
    params w_ih (3H,I), w_hh (3H,H), b_ih (3H,), b_hh (3H,).
    Returns (outputs (T,B,H), hidden (1,B,H))."""
    T, B, I = seq_input.shape
    H = hidden.shape[-1]
    out_dtype = seq_input.dtype

    # ---- padded sizes: lane-dense H, sublane-dense B, T multiple of block_t
    Hp = _round_up(H, 128)
    block_t = max(1, min(block_t, T))
    Tp = _round_up(T, block_t)
    Bp = _round_up(B, 8)
    if block_b is None:
        block_b = Bp
    else:
        block_b = min(_round_up(block_b, 8), Bp)
    Bp = _round_up(Bp, block_b)
    pad_t, pad_b, pad_h = Tp - T, Bp - B, Hp - H

    # ---- re-lay weights: gates fused along the lane dim, zero-padded to Hp
    w_ih3 = jnp.pad(w_ih.reshape(3, H, I), ((0, 0), (0, pad_h), (0, 0)))
    w_hh3 = jnp.pad(w_hh.reshape(3, H, H), ((0, 0), (0, pad_h), (0, pad_h)))
    wih_f = jnp.transpose(w_ih3, (2, 0, 1)).reshape(I, 3 * Hp)     # (I, 3Hp)
    whh_f = jnp.transpose(w_hh3, (2, 0, 1)).reshape(Hp, 3 * Hp)    # (Hp, 3Hp)

    b_i3 = jnp.pad(b_ih.reshape(3, H), ((0, 0), (0, pad_h)))
    b_h3 = jnp.pad(b_hh.reshape(3, H), ((0, 0), (0, pad_h)))
    # r/z hidden biases are always summed with the input biases -> pre-fold.
    b_gi = jnp.stack([b_i3[0] + b_h3[0], b_i3[1] + b_h3[1], b_i3[2]])
    b_gi = b_gi.reshape(1, 3 * Hp).astype(jnp.float32)
    b_hn = b_h3[2].reshape(1, Hp).astype(jnp.float32)

    # ---- pad activations (mask padded with 0 => padded steps keep hidden)
    x_p = jnp.pad(seq_input, ((0, pad_t), (0, pad_b), (0, 0)))      # (Tp,Bp,I)
    m_p = jnp.pad(seq_mask, ((0, pad_t), (0, pad_b)))[:, :, None]   # (Tp,Bp,1)
    h0_p = jnp.pad(hidden[0], ((0, pad_b), (0, pad_h)))             # (Bp,Hp)

    n_tb = Tp // block_t
    n_bb = Bp // block_b
    itemsize = jnp.dtype(out_dtype).itemsize

    # ---- pass 1: parallel gate-fused input projection over all timesteps
    proj_vmem = (wih_f.size * wih_f.dtype.itemsize + 3 * Hp * 4
                 + 2 * block_t * Bp * (I * x_p.dtype.itemsize + 3 * Hp * 4))
    gi = pl.pallas_call(
        _gi_proj_kernel,
        out_shape=jax.ShapeDtypeStruct((Tp, Bp, 3 * Hp), jnp.float32),
        grid_spec=pltpu.PrefetchScalarGridSpec(
            num_scalar_prefetch=0,
            grid=(n_tb,),
            in_specs=[
                pl.BlockSpec((block_t, Bp, I), lambda t: (t, 0, 0)),
                pl.BlockSpec((I, 3 * Hp), lambda t: (0, 0)),
                pl.BlockSpec((1, 3 * Hp), lambda t: (0, 0)),
            ],
            out_specs=pl.BlockSpec((block_t, Bp, 3 * Hp), lambda t: (t, 0, 0)),
        ),
        compiler_params=pltpu.CompilerParams(
            dimension_semantics=("parallel",),
            vmem_limit_bytes=_vmem_limit(proj_vmem)),
    )(x_p, wih_f, b_gi)

    # ---- pass 2: sequential recurrence (batch blocks parallel, time serial)
    rec_vmem = (whh_f.size * whh_f.dtype.itemsize           # resident W_hh
                + Hp * 4 + block_b * Hp * 4                 # b_hn + h0 block
                + 2 * block_t * block_b * (3 * Hp * 4       # gi (double buf)
                                           + 4              # mask
                                           + Hp * itemsize) # outputs
                + 2 * block_b * Hp * itemsize               # final hidden
                + block_b * Hp * 4)                         # scratch
    outputs_p, h_final_p = pl.pallas_call(
        _maskgru_rec_kernel,
        out_shape=(jax.ShapeDtypeStruct((Tp, Bp, Hp), out_dtype),
                   jax.ShapeDtypeStruct((Bp, Hp), out_dtype)),
        grid_spec=pltpu.PrefetchScalarGridSpec(
            num_scalar_prefetch=0,
            grid=(n_bb, n_tb),
            in_specs=[
                pl.BlockSpec((block_t, block_b, 3 * Hp), lambda b, t: (t, b, 0)),
                pl.BlockSpec((block_t, block_b, 1), lambda b, t: (t, b, 0)),
                pl.BlockSpec((block_b, Hp), lambda b, t: (b, 0)),
                pl.BlockSpec((Hp, 3 * Hp), lambda b, t: (0, 0)),
                pl.BlockSpec((1, Hp), lambda b, t: (0, 0)),
            ],
            out_specs=[
                pl.BlockSpec((block_t, block_b, Hp), lambda b, t: (t, b, 0)),
                pl.BlockSpec((block_b, Hp), lambda b, t: (b, 0)),
            ],
            scratch_shapes=[pltpu.VMEM((block_b, Hp), jnp.float32)],
        ),
        compiler_params=pltpu.CompilerParams(
            # batch blocks are independent (megacore on v7x); time is the
            # sequential recurrence.
            dimension_semantics=("parallel", "arbitrary"),
            vmem_limit_bytes=_vmem_limit(rec_vmem)),
    )(gi, m_p, h0_p, whh_f, b_hn)

    outputs = outputs_p[:T, :B, :H]
    h_final = h_final_p[:B, :H][None]
    return outputs, h_final


# ---------------------------------------------------------------------------
# Pure-JAX reference mirroring the PyTorch forward pass
# ---------------------------------------------------------------------------
def mask_gru_ref(seq_input, seq_mask, hidden, w_ih, w_hh, b_ih, b_hh):
    h = hidden[0]
    H = h.shape[-1]

    def step(h, inp):
        x, m = inp
        gi = x @ w_ih.T + b_ih
        gh = h @ w_hh.T + b_hh
        r = jax.nn.sigmoid(gi[:, 0:H] + gh[:, 0:H])
        z = jax.nn.sigmoid(gi[:, H:2 * H] + gh[:, H:2 * H])
        n = jnp.tanh(gi[:, 2 * H:] + r * gh[:, 2 * H:])
        h_t = (1.0 - z) * n + z * h
        mm = m[:, None]
        h_new = h_t * mm + h * (1.0 - mm)
        return h_new, h_t * mm

    h_fin, outs = jax.lax.scan(step, h, (seq_input, seq_mask))
    return outs, h_fin[None]


if __name__ == "__main__":
    T, B, I, H = 8, 2, 16, 32
    key = jax.random.PRNGKey(0)
    ks = jax.random.split(key, 8)

    bound = 1.0 / jnp.sqrt(jnp.float32(H))   # matches GRUCell.reset_parameters
    w_ih = jax.random.uniform(ks[0], (3 * H, I), jnp.float32, -bound, bound)
    w_hh = jax.random.uniform(ks[1], (3 * H, H), jnp.float32, -bound, bound)
    b_ih = jax.random.uniform(ks[2], (3 * H,), jnp.float32, -bound, bound)
    b_hh = jax.random.uniform(ks[3], (3 * H,), jnp.float32, -bound, bound)

    seq_input = jax.random.normal(ks[4], (T, B, I), jnp.float32)
    seq_mask = (jax.random.uniform(ks[5], (T, B)) > 0.3).astype(jnp.float32)
    hidden0 = jax.random.normal(ks[6], (1, B, H), jnp.float32)

    outs, h_fin = mask_gru_pallas(seq_input, seq_mask, hidden0,
                                  w_ih, w_hh, b_ih, b_hh)
    jax.block_until_ready((outs, h_fin))

    outs_ref, h_ref = mask_gru_ref(seq_input, seq_mask, hidden0,
                                   w_ih, w_hh, b_ih, b_hh)
    assert outs.shape == (T, B, H) and h_fin.shape == (1, B, H)
    assert jnp.allclose(outs, outs_ref, atol=1e-5, rtol=1e-5)
    assert jnp.allclose(h_fin, h_ref, atol=1e-5, rtol=1e-5)

    print("KERNEL_OK")
</pallas_src>

<mosaic_0001>
module attributes {stable_mosaic.version = 11 : i64} {
  func.func @_gi_proj_kernel(%arg0: i32, %arg1: memref<8x8x16xf32, #tpu.memory_space<vmem>>, %arg2: memref<16x384xf32, #tpu.memory_space<vmem>>, %arg3: memref<1x384xf32, #tpu.memory_space<vmem>>, %arg4: memref<8x8x384xf32, #tpu.memory_space<vmem>>) attributes {dimension_semantics = [#tpu.dimension_semantics<parallel>], iteration_bounds = array<i64: 1>, scalar_prefetch = 0 : i64, scratch_operands = 0 : i64, tpu.core_type = #tpu.core_type<tc>, window_params = [{transform_indices = @transform_0, window_bounds = array<i64: 8, 8, 16>}, {pipeline_mode = #tpu.pipeline_mode<synchronous>, transform_indices = @transform_1, window_bounds = array<i64: 16, 384>}, {pipeline_mode = #tpu.pipeline_mode<synchronous>, transform_indices = @transform_2, window_bounds = array<i64: 1, 384>}, {transform_indices = @transform_3, window_bounds = array<i64: 8, 8, 384>}]} {
    %c0 = arith.constant 0 : index
    %c0_0 = arith.constant 0 : index
    %c0_1 = arith.constant 0 : index
    %0 = vector.load %arg1[%c0, %c0_0, %c0_1] : memref<8x8x16xf32, #tpu.memory_space<vmem>>, vector<8x8x16xf32>
    %1 = vector.shape_cast %0 : vector<8x8x16xf32> to vector<64x16xf32>
    %c0_2 = arith.constant 0 : index
    %c0_3 = arith.constant 0 : index
    %2 = vector.load %arg2[%c0_2, %c0_3] : memref<16x384xf32, #tpu.memory_space<vmem>>, vector<16x384xf32>
    %cst = arith.constant dense<0.000000e+00> : vector<64x384xf32>
    %3 = tpu.matmul %1, %2, %cst {dimension_numbers = #tpu.dot_dimension_numbers<[1], [0], [0], [1], [0, 0, 1, 1], [], []>} : vector<64x16xf32>, vector<16x384xf32>, vector<64x384xf32> -> vector<64x384xf32>
    %4 = vector.shape_cast %3 : vector<64x384xf32> to vector<8x8x384xf32>
    %c0_4 = arith.constant 0 : index
    %c0_5 = arith.constant 0 : index
    %5 = vector.load %arg3[%c0_4, %c0_5] : memref<1x384xf32, #tpu.memory_space<vmem>>, vector<1x384xf32>
    %6 = vector.shape_cast %5 : vector<1x384xf32> to vector<1x1x384xf32>
    %7 = vector.broadcast %6 : vector<1x1x384xf32> to vector<8x8x384xf32>
    %8 = arith.addf %4, %7 : vector<8x8x384xf32>
    %c0_6 = arith.constant 0 : index
    %c0_7 = arith.constant 0 : index
    %c0_8 = arith.constant 0 : index
    %9 = vector.load %arg4[%c0_6, %c0_7, %c0_8] : memref<8x8x384xf32, #tpu.memory_space<vmem>>, vector<8x8x384xf32>
    tpu.vector_store %arg4[%c0_6, %c0_7, %c0_8], %8 {strides = array<i32>} : memref<8x8x384xf32, #tpu.memory_space<vmem>>, vector<8x8x384xf32>,
    return
  }
  func.func @transform_0(%arg0: i32) -> (i32, i32, i32) {
    %c0_i32 = arith.constant 0 : i32
    %c0_i32_0 = arith.constant 0 : i32
    %c0_i32_1 = arith.constant 0 : i32
    return %arg0, %c0_i32, %c0_i32_0 : i32, i32, i32
  }
  func.func @transform_1(%arg0: i32) -> (i32, i32) {
    %c0_i32 = arith.constant 0 : i32
    %c0_i32_0 = arith.constant 0 : i32
    %c0_i32_1 = arith.constant 0 : i32
    return %c0_i32, %c0_i32_0 : i32, i32
  }
  func.func @transform_2(%arg0: i32) -> (i32, i32) {
    %c0_i32 = arith.constant 0 : i32
    %c0_i32_0 = arith.constant 0 : i32
    %c0_i32_1 = arith.constant 0 : i32
    return %c0_i32, %c0_i32_0 : i32, i32
  }
  func.func @transform_3(%arg0: i32) -> (i32, i32, i32) {
    %c0_i32 = arith.constant 0 : i32
    %c0_i32_0 = arith.constant 0 : i32
    %c0_i32_1 = arith.constant 0 : i32
    return %arg0, %c0_i32, %c0_i32_0 : i32, i32, i32
  }
}

</mosaic_0001>

<bundles_post_ra>
// kernel: tpu_custom_call.1
= control target key start
LH: loop header
LB: loop body
LE: loop exit
PB: predicated region body
PF: predicated region fallthrough
CT: control target
= control target key end

     0   :  { %8 = vsyncpa [#allocation3], 0  ;;  %s624_s0 = inlined_call_operand.hbm [shape: f32[8,8,16], index: 0, kind: input, shape index: {}]   ;;  %s625_s1 = inlined_call_operand.hbm [shape: f32[16,384], index: 1, kind: input, shape index: {}]   ;;  %s626_s2 = inlined_call_operand.vmem [shape: f32[1,384], index: 2, kind: input, shape index: {}]   ;;  %s627_s3 = inlined_call_operand.hbm [shape: f32[8,8,384], index: 3, kind: output, shape index: {}]  }
   0x1   :  { %9 = vsyncpa [#allocation6], 0 }
   0x2   :  { %10 = vsyncpa [#allocation4], 0  ;;  %s515_s12 = smov [#allocation2]   ;;  %s443_s16 = scalar_lea.hbm %s624_s0, 1024 }
   0x3   :  { %s16_s13 = sshll.u32 %s515_s12, 4  ;;  %p444_p0 = scmp.ne.s32.totalorder %s624_s0, %s443_s16  ;;  %s17_s13 = int_to_ptr.vmem [resolvable:$true] %s16_s13 }
   0x4   :  { %p447_p1 = scmp.lt.u32.totalorder %s443_s16, %s624_s0 }
   0x6   :  { %p449_p2 = pnand %p447_p1, %p444_p0 }
   0x8   :  { %452 = shalt.err (!%p449_p2)
}
   0x9   :  { %s453_s21 = scalar_lea.vmem %s17_s13, 1024  ;;  %p458_p4 = scmp.lt.s32.totalorder %s17_s13, %s17_s13 }
   0xa   :  { %p454_p3 = scmp.ne.s32.totalorder %s17_s13, %s453_s21  ;;  %p459_p5 = scmp.lt.s32.totalorder %s453_s21, %s453_s21 }
   0xc   :  { %p460_p6 = por %p459_p5, %p458_p4 }
   0xe   :  { %p461_p7 = pnand %p460_p6, %p454_p3 }
  0x10   :  { %464 = shalt.err (!%p461_p7)
}
  0x11   :  { %s516_s22 = smov 128   ;;  %s517_s23 = smov 8  }
  0x12   :  { %22 = dma.hbm_to_vmem [thread:$0]  %s624_s0, 1024, %s17_s13, [#allocation3], %s516_s22, %s516_s22, %s517_s23  }
  0x13   :  { %s518_s26 = smov [#allocation5]   ;;  %s465_s30 = scalar_lea.hbm %s625_s1, 768 }
  0x14   :  { %s28_s27 = sshll.u32 %s518_s26, 4  ;;  %p466_p8 = scmp.ne.s32.totalorder %s625_s1, %s465_s30  ;;  %s29_s27 = int_to_ptr.vmem [resolvable:$true] %s28_s27 }
  0x15   :  { %p469_p9 = scmp.lt.u32.totalorder %s465_s30, %s625_s1 }
  0x17   :  { %p471_p10 = pnand %p469_p9, %p466_p8 }
  0x19   :  { %474 = shalt.err (!%p471_p10)
}
  0x1a   :  { %s475_s8 = scalar_lea.vmem %s29_s27, 768  ;;  %p480_p12 = scmp.lt.s32.totalorder %s29_s27, %s29_s27 }
  0x1b   :  { %p476_p11 = scmp.ne.s32.totalorder %s29_s27, %s475_s8  ;;  %p481_p13 = scmp.lt.s32.totalorder %s475_s8, %s475_s8 }
  0x1d   :  { %p482_p0 = por %p481_p13, %p480_p12 }
  0x1f   :  { %p483_p1 = pnand %p482_p0, %p476_p11 }
  0x21   :  { %486 = shalt.err (!%p483_p1)
}
  0x22   :  { %s519_s0 = smov 384   ;;  %s520_s9 = smov 24  }
  0x23   :  { %34 = dma.hbm_to_vmem [thread:$0]  %s625_s1, 768, %s29_s27, [#allocation6], %s519_s0, %s519_s0, %s520_s9  }
  0x24   :  { %509 = dma.done.wait [#allocation3], 1024  }
  0x25   :  { %510 = vsyncadd [#allocation3], 4294966272 }
  0x26   :  { %511 = dma.done.wait [#allocation6], 768  }
  0x27   :  { %512 = vsyncadd [#allocation6], 4294966528  ;;  %v521_v0 = vmov 0.0   ;;  %v52_v1 = vld [vmem:[#allocation5 + $0x8] sm:$0xff]  ;;  %v55_v2 = vld [vmem:[#allocation5 + $0x20] sm:$0xff]  ;;  %vm57_vm0 = vcmask 130048   ;;  %v302_v18 = vlaneseq }
  0x28   :  { %146 = vmatprep.mubr.f32.mxu0 %v521_v0  ;;  %182 = vmatprep.mubr.f32.mxu1 %v521_v0  ;;  %v51_v3 = vld [vmem:[#allocation5] sm:$0xff]  ;;  %v425_v4 = vpack.c.bf16 %v55_v2, %v52_v1  ;;  %v54_v5 = vld [vmem:[#allocation5 + $0x18] sm:$0xff]  ;;  %v53_v7 = vld [vmem:[#allocation5 + $0x10] sm:$0xff] }
  0x29   :  { %v427_v6 = vpack.c.bf16 %v54_v5, %v51_v3  ;;  %v56_v8 = vld [vmem:[#allocation5 + $0x28] sm:$0xff]  ;;  %v43_v10 = vld [vmem:[#allocation2] sm:$0xff]  ;;  %v49_v11 = vld [vmem:[#allocation2 + $0x30] sm:$0xff]  ;;  %v303_v19 = vshrl.u32 %v302_v18, 7 }
  0x2a   :  { %426 = vmatprep.subr.bf16.mxu0 %v425_v4  ;;  %433 = vmatprep.subr.bf16.mxu1 %v425_v4  ;;  %v429_v9 = vpack.c.bf16 %v56_v8, %v53_v7  ;;  %v44_v12 = vld [vmem:[#allocation2 + $0x8] sm:$0xff]  ;;  %v50_v13 = vld [vmem:[#allocation2 + $0x38] sm:$0xff]  ;;  %v45_v14 = vld [vmem:[#allocation2 + $0x10] sm:$0xff] }
  0x2b   :  { %428 = vmatpush1.bf16.msra.mxu0 %v427_v6  ;;  %434 = vmatpush1.bf16.msra.mxu1 %v427_v6  ;;  %v46_v15 = vld [vmem:[#allocation2 + $0x18] sm:$0xff]  ;;  %v47_v16 = vld [vmem:[#allocation2 + $0x20] sm:$0xff]  ;;  %v48_v17 = vld [vmem:[#allocation2 + $0x28] sm:$0xff]  ;;  %v304_v20 = vsub.s32 0, %v303_v19  ;;  %v308_v22 = vsub.s32 1, %v303_v19  ;;  %v312_v31 = vsub.s32 2, %v303_v19 }
  0x2c   :  { %430 = vmatprep.subr.bf16.mxu1 %v429_v9  ;;  %v300_v21 = vld [vmem:[%s626_s2] sm:$0x7]  ;;  %s522_s2 = smov [#allocation7]  }
  0x2d   :  { %v589_v23 = vrot.slane %v300_v21, %v304_v20  ;;  %v591_v24 = vrot.slane %v300_v21, %v308_v22  ;;  %v313_v40 = vrot.slane %v300_v21, %v312_v31  ;;  %s370_s13 = sshll.u32 %s522_s2, 4  ;;  %s371_s13 = int_to_ptr.vmem [resolvable:$true] %s370_s13 }
  0x2e   :  { %383 = vmatmul.mubr.msk.f32.vlgmr.msra.gmra.mrb[0].mxu0 %vm57_vm0, %v43_v10  ;;  %389 = vmatmul.mubr.msk.f32.vlgmr.msra.gmra.mrb[0].mxu1 %vm57_vm0, %v49_v11  ;;  %s487_s14 = scalar_lea.vmem %s371_s13, 3072  ;;  %p492_p3 = scmp.lt.s32.totalorder %s371_s13, %s371_s13 }
  0x2f   :  { %432 = vmatpush3.bf16.msra.mxu1 %v429_v9  ;;  %152 = vmatprep.mubr.f32.mxu0 %v521_v0  ;;  %p488_p2 = scmp.ne.s32.totalorder %s371_s13, %s487_s14  ;;  %p493_p4 = scmp.lt.s32.totalorder %s487_s14, %s487_s14 }
  0x30   :  { %188 = vmatprep.mubr.f32.mxu1 %v521_v0 }
  0x31   :  { %p494_p5 = por %p493_p4, %p492_p3 }
  0x32   :  { %384 = vmatmul.mubr.msk.f32.gmra.mrb[2].mxu0 %vm57_vm0, %v44_v12  ;;  %390 = vmatmul.mubr.msk.f32.gmra.mrb[2].mxu1 %vm57_vm0, %v50_v13 }
  0x33   :  { %158 = vmatprep.mubr.f32.mxu0 %v521_v0  ;;  %413 = vmatprep.mubr.msk.f32.mxu1 %vm57_vm0, %v43_v10  ;;  %p495_p6 = pnand %p494_p5, %p488_p2 }
  0x36   :  { %385 = vmatmul.mubr.msk.f32.gmra.mrb[4].mxu0 %vm57_vm0, %v45_v14  ;;  %414 = vmatmul.mubr.msk.f32.vlgmr.msra.gmra.mrb[4].mxu1 %vm57_vm0, %v44_v12 }
  0x37   :  { %164 = vmatprep.mubr.f32.mxu0 %v521_v0  ;;  %416 = vmatprep.mubr.msk.f32.mxu1 %vm57_vm0, %v45_v14 }
  0x3a   :  { %386 = vmatmul.mubr.msk.f32.gmra.mrb[6].mxu0 %vm57_vm0, %v46_v15  ;;  %417 = vmatmul.mubr.msk.f32.gmra.mrb[6].mxu1 %vm57_vm0, %v46_v15 }
  0x3b   :  { %170 = vmatprep.mubr.f32.mxu0 %v521_v0  ;;  %419 = vmatprep.mubr.msk.f32.mxu1 %vm57_vm0, %v47_v16 }
  0x3e   :  { %387 = vmatmul.mubr.msk.f32.gmra.mrb[8].mxu0 %vm57_vm0, %v47_v16  ;;  %420 = vmatmul.mubr.msk.f32.gmra.mrb[8].mxu1 %vm57_vm0, %v48_v17 }
  0x3f   :  { %176 = vmatprep.mubr.f32.mxu0 %v521_v0  ;;  %422 = vmatprep.mubr.msk.f32.mxu1 %vm57_vm0, %v49_v11 }
  0x42   :  { %388 = vmatmul.mubr.msk.f32.gmra.mrb[10].mxu0 %vm57_vm0, %v48_v17  ;;  %423 = vmatmul.mubr.msk.f32.gmra.mrb[10].mxu1 %vm57_vm0, %v50_v13 }
 0x101   :  { %v148_v25 = vpop.f32.mrb[0].mxu0  ;;  %v184_v26 = vpop.f32.mrb[0].mxu1 }
 0x102   :  { %v317_v27 = vadd.f32 %v589_v23, %v148_v25  ;;  %v335_v28 = vadd.f32 %v589_v23, %v184_v26  ;;  %v150_v29 = vpop.f32.mrb[1].mxu0  ;;  %v186_v30 = vpop.f32.mrb[1].mxu1 }
 0x103   :  { %v318_v32 = vadd.f32 %v591_v24, %v150_v29  ;;  %v336_v33 = vadd.f32 %v591_v24, %v186_v30 }
 0x104   :  { %341 = vst [vmem:[#allocation7] sm:$0xff] %v317_v27  ;;  %359 = vst [vmem:[#allocation7 + $0x90] sm:$0xff] %v335_v28 }
 0x105   :  { %342 = vst [vmem:[#allocation7 + $0x8] sm:$0xff] %v318_v32  ;;  %360 = vst [vmem:[#allocation7 + $0x98] sm:$0xff] %v336_v33  ;;  %v154_v34 = vpop.f32.mrb[2].mxu0  ;;  %v190_v35 = vpop.f32.mrb[2].mxu1 }
 0x106   :  { %v320_v36 = vadd.f32 %v589_v23, %v154_v34  ;;  %v338_v37 = vadd.f32 %v589_v23, %v190_v35  ;;  %v156_v38 = vpop.f32.mrb[3].mxu0  ;;  %v192_v39 = vpop.f32.mrb[3].mxu1 }
 0x107   :  { %v321_v41 = vadd.f32 %v591_v24, %v156_v38  ;;  %v339_v42 = vadd.f32 %v591_v24, %v192_v39 }
 0x108   :  { %344 = vst [vmem:[#allocation7 + $0x18] sm:$0xff] %v320_v36  ;;  %362 = vst [vmem:[#allocation7 + $0xa8] sm:$0xff] %v338_v37 }
 0x109   :  { %345 = vst [vmem:[#allocation7 + $0x20] sm:$0xff] %v321_v41  ;;  %363 = vst [vmem:[#allocation7 + $0xb0] sm:$0xff] %v339_v42  ;;  %v160_v43 = vpop.f32.mrb[4].mxu0  ;;  %v415_v44 = vpop.f32.mrb[4].mxu1 }
 0x10a   :  { %v323_v45 = vadd.f32 %v589_v23, %v160_v43  ;;  %v322_v46 = vadd.f32 %v415_v44, %v313_v40  ;;  %v162_v47 = vpop.f32.mrb[5].mxu0  ;;  %v261_v48 = vpop.f32.mrb[5].mxu1 }
 0x10b   :  { %v324_v49 = vadd.f32 %v591_v24, %v162_v47  ;;  %v319_v50 = vadd.f32 %v313_v40, %v261_v48 }
 0x10c   :  { %347 = vst [vmem:[#allocation7 + $0x30] sm:$0xff] %v323_v45  ;;  %346 = vst [vmem:[#allocation7 + $0x28] sm:$0xff] %v322_v46 }
 0x10d   :  { %348 = vst [vmem:[#allocation7 + $0x38] sm:$0xff] %v324_v49  ;;  %343 = vst [vmem:[#allocation7 + $0x10] sm:$0xff] %v319_v50  ;;  %v166_v51 = vpop.f32.mrb[6].mxu0  ;;  %v418_v52 = vpop.f32.mrb[6].mxu1 }
 0x10e   :  { %v326_v53 = vadd.f32 %v589_v23, %v166_v51  ;;  %v328_v54 = vadd.f32 %v418_v52, %v313_v40  ;;  %v168_v55 = vpop.f32.mrb[7].mxu0  ;;  %v271_v56 = vpop.f32.mrb[7].mxu1 }
 0x10f   :  { %v327_v57 = vadd.f32 %v591_v24, %v168_v55  ;;  %v325_v58 = vadd.f32 %v313_v40, %v271_v56 }
 0x110   :  { %350 = vst [vmem:[#allocation7 + $0x48] sm:$0xff] %v326_v53  ;;  %352 = vst [vmem:[#allocation7 + $0x58] sm:$0xff] %v328_v54 }
 0x111   :  { %351 = vst [vmem:[#allocation7 + $0x50] sm:$0xff] %v327_v57  ;;  %349 = vst [vmem:[#allocation7 + $0x40] sm:$0xff] %v325_v58  ;;  %v172_v59 = vpop.f32.mrb[8].mxu0  ;;  %v421_v60 = vpop.f32.mrb[8].mxu1 }
 0x112   :  { %v329_v61 = vadd.f32 %v589_v23, %v172_v59  ;;  %v334_v62 = vadd.f32 %v421_v60, %v313_v40  ;;  %v174_v63 = vpop.f32.mrb[9].mxu0  ;;  %v281_v0 = vpop.f32.mrb[9].mxu1 }
 0x113   :  { %v330_v1 = vadd.f32 %v591_v24, %v174_v63  ;;  %v331_v2 = vadd.f32 %v313_v40, %v281_v0 }
 0x114   :  { %353 = vst [vmem:[#allocation7 + $0x60] sm:$0xff] %v329_v61  ;;  %358 = vst [vmem:[#allocation7 + $0x88] sm:$0xff] %v334_v62 }
 0x115   :  { %354 = vst [vmem:[#allocation7 + $0x68] sm:$0xff] %v330_v1  ;;  %355 = vst [vmem:[#allocation7 + $0x70] sm:$0xff] %v331_v2  ;;  %v178_v3 = vpop.f32.mrb[10].mxu0  ;;  %v424_v4 = vpop.f32.mrb[10].mxu1 }
 0x116   :  { %v332_v5 = vadd.f32 %v589_v23, %v178_v3  ;;  %v340_v6 = vadd.f32 %v424_v4, %v313_v40  ;;  %v180_v7 = vpop.f32.mrb[11].mxu0  ;;  %v291_v8 = vpop.f32.mrb[11].mxu1 }
 0x117   :  { %v333_v9 = vadd.f32 %v591_v24, %v180_v7  ;;  %v337_v10 = vadd.f32 %v313_v40, %v291_v8 }
 0x118   :  { %356 = vst [vmem:[#allocation7 + $0x78] sm:$0xff] %v332_v5  ;;  %364 = vst [vmem:[#allocation7 + $0xb8] sm:$0xff] %v340_v6 }
 0x119   :  { %357 = vst [vmem:[#allocation7 + $0x80] sm:$0xff] %v333_v9  ;;  %361 = vst [vmem:[#allocation7 + $0xa0] sm:$0xff] %v337_v10 }
 0x11a   :  { %498 = shalt.err (!%p495_p6)
}
 0x11b   :  { %s499_s17 = scalar_lea.hbm %s627_s3, 3072 }
 0x11c   :  { %p500_p7 = scmp.ne.s32.totalorder %s627_s3, %s499_s17  ;;  %p503_p8 = scmp.lt.u32.totalorder %s499_s17, %s627_s3 }
 0x11e   :  { %p505_p9 = pnand %p503_p8, %p500_p7 }
 0x120   :  { %508 = shalt.err (!%p505_p9)
}
 0x121   :  { %376 = dma.vmem_to_hbm [thread:$0]  %s371_s13, 3072, %s627_s3, [#allocation4], %s519_s0, %s519_s0, %s520_s9  }
 0x122   :  { %513 = dma.done.wait [#allocation4], 3072  }
 0x123   :  { %514 = vsyncadd [#allocation4], 4294964224 }
 0x124   :  { %380 = vsyncpa [#allocation3], 1 }
 0x125   :  { %381 = vsyncpa [#allocation6], 1 }
 0x126   :  { %382 = vsyncpa [#allocation4], 1 }

</bundles_post_ra>
